<compile_context>
chip_gen: v5e
topology: v5e:2x2
jax: 0.10.0
libtpu: 0.0.40
codegen_flags: <defaults>
</compile_context>

<pallas_src>
import jax
import jax.numpy as jnp
from jax import lax
from jax.experimental import pallas as pl
from jax.experimental.pallas import tpu as pltpu


def _round_up(x, m):
    return (x + m - 1) // m * m


# -----------------------------------------------------------------------------
# Fused PCA kernel.  Grid = (m_tiles, n_tiles), n innermost.
#   x_ref : (TM, Kp)  f32  row block of flattened input (resident over n)
#   m_ref : (Kp, Hd)  f32  full weight, encoder orientation (resident over grid)
#   mt_ref: (Hd, TN)  f32  transposed-weight column tile, decoder orientation
#   o_ref : (TM, TN)  f32  lane-dense output tile
#   h_ref : (TM, Hd)  f32  VMEM scratch: hidden code of this row block
# -----------------------------------------------------------------------------
def _pca_kernel(x_ref, m_ref, mt_ref, o_ref, h_ref):
    n = pl.program_id(1)

    # Encoder matmul: computed once per row block, reused for every output tile.
    @pl.when(n == 0)
    def _():
        h_ref[...] = jnp.dot(x_ref[...], m_ref[...],
                             preferred_element_type=jnp.float32)

    # Decoder matmul (MXU-native orientation, no transpose in the kernel).
    y = jnp.dot(h_ref[...], mt_ref[...], preferred_element_type=jnp.float32)

    # sigmoid(y) == 0.5 * (tanh(y/2) + 1): tanh goes to the EUP slot, only a
    # mul+add remain on the VALU path.
    o_ref[...] = (0.5 * (jnp.tanh(0.5 * y) + 1.0)).astype(o_ref.dtype)


def pca_forward(x_nchw, matrix):
    """x_nchw: (B, C, H, W) float32.  matrix: (C*H*W, hidden) float32."""
    B, C, H, W = x_nchw.shape
    K = C * H * W
    Hd = matrix.shape[1]
    assert matrix.shape[0] == K, (matrix.shape, K)

    x = x_nchw.reshape(B, K).astype(jnp.float32)
    m = matrix.astype(jnp.float32)

    LANE = 128

    # Output-width tile: lane multiple chosen to minimize K padding (prefer wider).
    TN, best_pad = 1024, None
    for tn in (1024, 512, 256, 128):
        pad = _round_up(K, tn) - K
        if best_pad is None or pad < best_pad:
            TN, best_pad = tn, pad
    Kp = _round_up(K, TN)

    # Row tile: multiple of 8; when B allows, split into >= 2 tiles so the
    # "parallel" m axis gives both v7x TensorCores work.
    TM = min(256, _round_up(B, 8))
    if B > 8:
        TM = min(TM, _round_up((B + 1) // 2, 8))

    # Generation-aware VMEM budget (v7x: 64 MiB, v5e/v6e: 128 MiB) with headroom.
    try:
        vmem_cap = int(pltpu.get_tpu_info().vmem_capacity_bytes)
    except Exception:
        vmem_cap = 64 * 1024 * 1024
    budget = max(vmem_cap - 16 * 1024 * 1024, 16 * 1024 * 1024)

    hd_lanes = _round_up(Hd, LANE)  # narrow minor dims still occupy 128 lanes in VMEM

    def footprint(tm, tn):
        return 4 * (2 * tm * Kp          # x row block (double-buffered)
                    + 2 * Kp * hd_lanes  # resident encoder weight
                    + 2 * Hd * tn        # streamed decoder weight tile
                    + 2 * tm * tn        # output tile
                    + tm * hd_lanes)     # hidden-code scratch

    # Shrink tiles (rows first, then output width) until the footprint fits.
    # TODO(synk): for very large input_size K, add a K-tile reduction axis for the
    # encoder instead of keeping the full-K row block resident in VMEM.
    while footprint(TM, TN) > budget and TM > 8:
        TM = max(8, _round_up(TM // 2, 8))
    while footprint(TM, TN) > budget and TN > 128:
        TN //= 2

    Mp = _round_up(B, TM)
    vmem_limit = int(min(budget, max(footprint(TM, TN) + (2 << 20), 16 << 20)))

    # Pad ONLY K (and batch rows); the hidden dim keeps its true size.  Padded rows /
    # columns are exact zeros in both contractions and are sliced off below.
    xp = x if (Mp == B and Kp == K) else jnp.pad(x, ((0, Mp - B), (0, Kp - K)))
    mp = m if Kp == K else jnp.pad(m, ((0, Kp - K), (0, 0)))
    mtp = mp.T  # (Hd, Kp): cheap wrapper-side transpose -> MXU-native decoder RHS.

    out = pl.pallas_call(
        _pca_kernel,
        out_shape=jax.ShapeDtypeStruct((Mp, Kp), jnp.float32),
        grid_spec=pltpu.PrefetchScalarGridSpec(
            num_scalar_prefetch=0,
            grid=(Mp // TM, Kp // TN),
            in_specs=[
                pl.BlockSpec((TM, Kp), lambda i, j: (i, 0)),   # x row block
                pl.BlockSpec((Kp, Hd), lambda i, j: (0, 0)),   # encoder weight (resident)
                pl.BlockSpec((Hd, TN), lambda i, j: (0, j)),   # decoder weight tile
            ],
            out_specs=pl.BlockSpec((TM, TN), lambda i, j: (i, j)),
            scratch_shapes=[pltpu.VMEM((TM, Hd), jnp.float32)],
        ),
        compiler_params=pltpu.CompilerParams(
            dimension_semantics=("parallel", "arbitrary"),
            vmem_limit_bytes=vmem_limit,
        ),
    )(xp, mp, mtp)

    y = out[:B, :K]
    return y.reshape(B, C, H, W)


if __name__ == "__main__":
    BATCH, NUM_CH, IMG_SIDE, HIDDEN = 2, 4, 16, 32
    INPUT_SIZE = NUM_CH * IMG_SIDE * IMG_SIDE

    key = jax.random.PRNGKey(0)
    k_m, k_x = jax.random.split(key)
    matrix = jax.random.normal(k_m, (INPUT_SIZE, HIDDEN), jnp.float32)   # torch.randn init
    x = jax.random.normal(k_x, (BATCH, NUM_CH, IMG_SIDE, IMG_SIDE), jnp.float32)

    fwd = jax.jit(pca_forward)
    out = fwd(x, matrix)
    jax.block_until_ready(out)

    # Pure-JAX full-precision reference.
    xf = x.reshape(BATCH, -1)
    h_ref = jnp.matmul(xf, matrix, precision=lax.Precision.HIGHEST)
    y_ref = jnp.matmul(h_ref, matrix.T, precision=lax.Precision.HIGHEST)
    ref = jax.nn.sigmoid(y_ref).reshape(BATCH, NUM_CH, IMG_SIDE, IMG_SIDE)

    assert out.shape == (BATCH, NUM_CH, IMG_SIDE, IMG_SIDE)
    assert bool(jnp.all(jnp.isfinite(out)))
    assert bool(jnp.all((out >= 0.0) & (out <= 1.0)))
    assert bool(jnp.allclose(out, ref, atol=5e-3)), float(jnp.max(jnp.abs(out - ref)))

    print("KERNEL_OK")
</pallas_src>

<mosaic_0001>
module attributes {stable_mosaic.version = 11 : i64} {
  func.func @_pca_kernel(%arg0: i32, %arg1: i32, %arg2: memref<8x1024xf32, #tpu.memory_space<vmem>>, %arg3: memref<1024x32xf32, #tpu.memory_space<vmem>>, %arg4: memref<32x1024xf32, #tpu.memory_space<vmem>>, %arg5: memref<8x1024xf32, #tpu.memory_space<vmem>>, %arg6: memref<8x32xf32, #tpu.memory_space<vmem>>) attributes {dimension_semantics = [#tpu.dimension_semantics<parallel>, #tpu.dimension_semantics<arbitrary>], iteration_bounds = array<i64: 1, 1>, scalar_prefetch = 0 : i64, scratch_operands = 1 : i64, tpu.core_type = #tpu.core_type<tc>, window_params = [{transform_indices = @transform_0, window_bounds = array<i64: 8, 1024>}, {pipeline_mode = #tpu.pipeline_mode<synchronous>, transform_indices = @transform_1, window_bounds = array<i64: 1024, 32>}, {transform_indices = @transform_2, window_bounds = array<i64: 32, 1024>}, {transform_indices = @transform_3, window_bounds = array<i64: 8, 1024>}]} {
    %c0_i32 = arith.constant 0 : i32
    %0 = arith.cmpi eq, %arg1, %c0_i32 : i32
    %1 = arith.extui %0 : i1 to i32
    %c0_i32_0 = arith.constant 0 : i32
    %2 = arith.cmpi ne, %1, %c0_i32_0 : i32
    scf.if %2 {
      %c0_9 = arith.constant 0 : index
      %c0_10 = arith.constant 0 : index
      %14 = vector.load %arg2[%c0_9, %c0_10] : memref<8x1024xf32, #tpu.memory_space<vmem>>, vector<8x1024xf32>
      %c0_11 = arith.constant 0 : index
      %c0_12 = arith.constant 0 : index
      %15 = vector.load %arg3[%c0_11, %c0_12] : memref<1024x32xf32, #tpu.memory_space<vmem>>, vector<1024x32xf32>
      %cst_13 = arith.constant dense<0.000000e+00> : vector<8x32xf32>
      %16 = tpu.matmul %14, %15, %cst_13 {dimension_numbers = #tpu.dot_dimension_numbers<[1], [0], [0], [1], [0, 0, 1, 1], [], []>} : vector<8x1024xf32>, vector<1024x32xf32>, vector<8x32xf32> -> vector<8x32xf32>
      %c0_14 = arith.constant 0 : index
      %c0_15 = arith.constant 0 : index
      %17 = vector.load %arg6[%c0_14, %c0_15] : memref<8x32xf32, #tpu.memory_space<vmem>>, vector<8x32xf32>
      tpu.vector_store %arg6[%c0_14, %c0_15], %16 {strides = array<i32>} : memref<8x32xf32, #tpu.memory_space<vmem>>, vector<8x32xf32>,
    } else {
    }
    %c0 = arith.constant 0 : index
    %c0_1 = arith.constant 0 : index
    %3 = vector.load %arg6[%c0, %c0_1] : memref<8x32xf32, #tpu.memory_space<vmem>>, vector<8x32xf32>
    %c0_2 = arith.constant 0 : index
    %c0_3 = arith.constant 0 : index
    %4 = vector.load %arg4[%c0_2, %c0_3] : memref<32x1024xf32, #tpu.memory_space<vmem>>, vector<32x1024xf32>
    %cst = arith.constant dense<0.000000e+00> : vector<8x1024xf32>
    %5 = tpu.matmul %3, %4, %cst {dimension_numbers = #tpu.dot_dimension_numbers<[1], [0], [0], [1], [0, 0, 1, 1], [], []>} : vector<8x32xf32>, vector<32x1024xf32>, vector<8x1024xf32> -> vector<8x1024xf32>
    %cst_4 = arith.constant 5.000000e-01 : f32
    %6 = vector.broadcast %cst_4 : f32 to vector<8x1024xf32>
    %7 = arith.mulf %6, %5 : vector<8x1024xf32>
    %8 = math.tanh %7 : vector<8x1024xf32>
    %cst_5 = arith.constant 1.000000e+00 : f32
    %9 = vector.broadcast %cst_5 : f32 to vector<8x1024xf32>
    %10 = arith.addf %8, %9 : vector<8x1024xf32>
    %cst_6 = arith.constant 5.000000e-01 : f32
    %11 = vector.broadcast %cst_6 : f32 to vector<8x1024xf32>
    %12 = arith.mulf %11, %10 : vector<8x1024xf32>
    %c0_7 = arith.constant 0 : index
    %c0_8 = arith.constant 0 : index
    %13 = vector.load %arg5[%c0_7, %c0_8] : memref<8x1024xf32, #tpu.memory_space<vmem>>, vector<8x1024xf32>
    tpu.vector_store %arg5[%c0_7, %c0_8], %12 {strides = array<i32>} : memref<8x1024xf32, #tpu.memory_space<vmem>>, vector<8x1024xf32>,
    return
  }
  func.func @transform_0(%arg0: i32, %arg1: i32) -> (i32, i32) {
    %c0_i32 = arith.constant 0 : i32
    %c0_i32_0 = arith.constant 0 : i32
    return %arg0, %c0_i32 : i32, i32
  }
  func.func @transform_1(%arg0: i32, %arg1: i32) -> (i32, i32) {
    %c0_i32 = arith.constant 0 : i32
    %c0_i32_0 = arith.constant 0 : i32
    %c0_i32_1 = arith.constant 0 : i32
    return %c0_i32, %c0_i32_0 : i32, i32
  }
  func.func @transform_2(%arg0: i32, %arg1: i32) -> (i32, i32) {
    %c0_i32 = arith.constant 0 : i32
    %c0_i32_0 = arith.constant 0 : i32
    return %c0_i32, %arg1 : i32, i32
  }
  func.func @transform_3(%arg0: i32, %arg1: i32) -> (i32, i32) {
    %c0_i32 = arith.constant 0 : i32
    return %arg0, %arg1 : i32, i32
  }
}

</mosaic_0001>

<bundles_post_ra>
// kernel: pca_forward.1
= control target key start
LH: loop header
LB: loop body
LE: loop exit
PB: predicated region body
PF: predicated region fallthrough
CT: control target
= control target key end

     0   :  { %vm314_vm0 = vcmask 261120   ;;  %s1129_s1 = inlined_call_operand.vmem [shape: f32[1024,32], index: 1, kind: input, shape index: {}]   ;;  %s1130_s0 = inlined_call_operand.vmem [shape: f32[8,1024], index: 0, kind: input, shape index: {}]   ;;  %s1131_s2 = inlined_call_operand.vmem [shape: f32[32,1024], index: 2, kind: input, shape index: {}]   ;;  %s1132_s3 = inlined_call_operand.vmem [shape: f32[8,1024], index: 3, kind: output, shape index: {}]  }
   0x1   :  { %v41_v0 = vld [vmem:[%s1129_s1 + $0x78] sm:$0xff]  ;;  %v40_v2 = vld [vmem:[%s1129_s1 + $0x70] sm:$0xff]  ;;  %v39_v6 = vld [vmem:[%s1129_s1 + $0x68] sm:$0xff] }
   0x2   :  { %v73_v1 = vld [vmem:[%s1129_s1 + $0x178] sm:$0xff]  ;;  %154 = vmatpush.msra.mxu0 %v41_v0  ;;  %v72_v4 = vld [vmem:[%s1129_s1 + $0x170] sm:$0xff]  ;;  %v71_v8 = vld [vmem:[%s1129_s1 + $0x168] sm:$0xff] }
   0x3   :  { %194 = vmatpush.msra.mxu2 %v73_v1  ;;  %v57_v3 = vld [vmem:[%s1129_s1 + $0xf8] sm:$0xff]  ;;  %v56_v7 = vld [vmem:[%s1129_s1 + $0xf0] sm:$0xff]  ;;  %v55_v10 = vld [vmem:[%s1129_s1 + $0xe8] sm:$0xff] }
   0x4   :  { %v89_v5 = vld [vmem:[%s1129_s1 + $0x1f8] sm:$0xff]  ;;  %174 = vmatpush.msra.mxu1 %v57_v3  ;;  %155 = vmatpush.msra.mxu0 %v40_v2  ;;  %v88_v9 = vld [vmem:[%s1129_s1 + $0x1f0] sm:$0xff]  ;;  %v38_v11 = vld [vmem:[%s1129_s1 + $0x60] sm:$0xff] }
   0x5   :  { %214 = vmatpush.msra.mxu3 %v89_v5  ;;  %195 = vmatpush.msra.mxu2 %v72_v4  ;;  %v70_v12 = vld [vmem:[%s1129_s1 + $0x160] sm:$0xff]  ;;  %v87_v13 = vld [vmem:[%s1129_s1 + $0x1e8] sm:$0xff]  ;;  %v37_v16 = vld [vmem:[%s1129_s1 + $0x58] sm:$0xff] }
   0x6   :  { %175 = vmatpush.msra.mxu1 %v56_v7  ;;  %156 = vmatpush.msra.mxu0 %v39_v6  ;;  %v54_v14 = vld [vmem:[%s1129_s1 + $0xe0] sm:$0xff]  ;;  %v69_v17 = vld [vmem:[%s1129_s1 + $0x158] sm:$0xff]  ;;  %v36_v20 = vld [vmem:[%s1129_s1 + $0x50] sm:$0xff] }
   0x7   :  { %215 = vmatpush.msra.mxu3 %v88_v9  ;;  %196 = vmatpush.msra.mxu2 %v71_v8  ;;  %v86_v15 = vld [vmem:[%s1129_s1 + $0x1e0] sm:$0xff]  ;;  %v53_v18 = vld [vmem:[%s1129_s1 + $0xd8] sm:$0xff]  ;;  %v68_v21 = vld [vmem:[%s1129_s1 + $0x150] sm:$0xff] }
   0x8   :  { %176 = vmatpush.msra.mxu1 %v55_v10  ;;  %157 = vmatpush.msra.mxu0 %v38_v11  ;;  %v85_v19 = vld [vmem:[%s1129_s1 + $0x1d8] sm:$0xff]  ;;  %v52_v22 = vld [vmem:[%s1129_s1 + $0xd0] sm:$0xff]  ;;  %v35_v24 = vld [vmem:[%s1129_s1 + $0x48] sm:$0xff] }
   0x9   :  { %216 = vmatpush.msra.mxu3 %v87_v13  ;;  %197 = vmatpush.msra.mxu2 %v70_v12  ;;  %v84_v23 = vld [vmem:[%s1129_s1 + $0x1d0] sm:$0xff]  ;;  %v67_v25 = vld [vmem:[%s1129_s1 + $0x148] sm:$0xff]  ;;  %v34_v28 = vld [vmem:[%s1129_s1 + $0x40] sm:$0xff] }
   0xa   :  { %177 = vmatpush.msra.mxu1 %v54_v14  ;;  %158 = vmatpush.msra.mxu0 %v37_v16  ;;  %v51_v26 = vld [vmem:[%s1129_s1 + $0xc8] sm:$0xff]  ;;  %v66_v29 = vld [vmem:[%s1129_s1 + $0x140] sm:$0xff]  ;;  %v33_v32 = vld [vmem:[%s1129_s1 + $0x38] sm:$0xff] }
   0xb   :  { %217 = vmatpush.msra.mxu3 %v86_v15  ;;  %198 = vmatpush.msra.mxu2 %v69_v17  ;;  %v83_v27 = vld [vmem:[%s1129_s1 + $0x1c8] sm:$0xff]  ;;  %v50_v30 = vld [vmem:[%s1129_s1 + $0xc0] sm:$0xff]  ;;  %v65_v33 = vld [vmem:[%s1129_s1 + $0x138] sm:$0xff] }
   0xc   :  { %178 = vmatpush.msra.mxu1 %v53_v18  ;;  %159 = vmatpush.msra.mxu0 %v36_v20  ;;  %v82_v31 = vld [vmem:[%s1129_s1 + $0x1c0] sm:$0xff]  ;;  %v49_v34 = vld [vmem:[%s1129_s1 + $0xb8] sm:$0xff]  ;;  %v32_v36 = vld [vmem:[%s1129_s1 + $0x30] sm:$0xff] }
   0xd   :  { %218 = vmatpush.msra.mxu3 %v85_v19  ;;  %199 = vmatpush.msra.mxu2 %v68_v21  ;;  %v81_v35 = vld [vmem:[%s1129_s1 + $0x1b8] sm:$0xff]  ;;  %v64_v37 = vld [vmem:[%s1129_s1 + $0x130] sm:$0xff]  ;;  %v31_v40 = vld [vmem:[%s1129_s1 + $0x28] sm:$0xff] }
   0xe   :  { %179 = vmatpush.msra.mxu1 %v52_v22  ;;  %160 = vmatpush.msra.mxu0 %v35_v24  ;;  %v48_v38 = vld [vmem:[%s1129_s1 + $0xb0] sm:$0xff]  ;;  %v63_v41 = vld [vmem:[%s1129_s1 + $0x128] sm:$0xff]  ;;  %v30_v44 = vld [vmem:[%s1129_s1 + $0x20] sm:$0xff] }
   0xf   :  { %219 = vmatpush.msra.mxu3 %v84_v23  ;;  %200 = vmatpush.msra.mxu2 %v67_v25  ;;  %v80_v39 = vld [vmem:[%s1129_s1 + $0x1b0] sm:$0xff]  ;;  %v47_v42 = vld [vmem:[%s1129_s1 + $0xa8] sm:$0xff]  ;;  %v62_v45 = vld [vmem:[%s1129_s1 + $0x120] sm:$0xff] }
  0x10   :  { %180 = vmatpush.msra.mxu1 %v51_v26  ;;  %161 = vmatpush.msra.mxu0 %v34_v28  ;;  %v79_v43 = vld [vmem:[%s1129_s1 + $0x1a8] sm:$0xff]  ;;  %v46_v46 = vld [vmem:[%s1129_s1 + $0xa0] sm:$0xff]  ;;  %v29_v48 = vld [vmem:[%s1129_s1 + $0x18] sm:$0xff] }
  0x11   :  { %220 = vmatpush.msra.mxu3 %v83_v27  ;;  %201 = vmatpush.msra.mxu2 %v66_v29  ;;  %v78_v47 = vld [vmem:[%s1129_s1 + $0x1a0] sm:$0xff]  ;;  %v61_v49 = vld [vmem:[%s1129_s1 + $0x118] sm:$0xff]  ;;  %v28_v52 = vld [vmem:[%s1129_s1 + $0x10] sm:$0xff] }
  0x12   :  { %181 = vmatpush.msra.mxu1 %v50_v30  ;;  %162 = vmatpush.msra.mxu0 %v33_v32  ;;  %v45_v50 = vld [vmem:[%s1129_s1 + $0x98] sm:$0xff]  ;;  %v60_v53 = vld [vmem:[%s1129_s1 + $0x110] sm:$0xff]  ;;  %v27_v56 = vld [vmem:[%s1129_s1 + $0x8] sm:$0xff] }
  0x13   :  { %221 = vmatpush.msra.mxu3 %v82_v31  ;;  %202 = vmatpush.msra.mxu2 %v65_v33  ;;  %v77_v51 = vld [vmem:[%s1129_s1 + $0x198] sm:$0xff]  ;;  %v44_v54 = vld [vmem:[%s1129_s1 + $0x90] sm:$0xff]  ;;  %v59_v57 = vld [vmem:[%s1129_s1 + $0x108] sm:$0xff] }
  0x14   :  { %182 = vmatpush.msra.mxu1 %v49_v34  ;;  %163 = vmatpush.msra.mxu0 %v32_v36  ;;  %v76_v55 = vld [vmem:[%s1129_s1 + $0x190] sm:$0xff]  ;;  %v43_v58 = vld [vmem:[%s1129_s1 + $0x88] sm:$0xff]  ;;  %v26_v60 = vld [vmem:[%s1129_s1] sm:$0xff] }
  0x15   :  { %222 = vmatpush.msra.mxu3 %v81_v35  ;;  %203 = vmatpush.msra.mxu2 %v64_v37  ;;  %v75_v59 = vld [vmem:[%s1129_s1 + $0x188] sm:$0xff]  ;;  %v58_v61 = vld [vmem:[%s1129_s1 + $0x100] sm:$0xff]  ;;  %v105_v62 = vld [vmem:[%s1129_s1 + $0x278] sm:$0xff] }
  0x16   :  { %183 = vmatpush.msra.mxu1 %v48_v38  ;;  %164 = vmatpush.msra.mxu0 %v31_v40  ;;  %v137_v63 = vld [vmem:[%s1129_s1 + $0x378] sm:$0xff]  ;;  %v42_v0 = vld [vmem:[%s1129_s1 + $0x80] sm:$0xff]  ;;  %v104_v2 = vld [vmem:[%s1129_s1 + $0x270] sm:$0xff] }
  0x17   :  { %223 = vmatpush.msra.mxu3 %v80_v39  ;;  %204 = vmatpush.msra.mxu2 %v63_v41  ;;  %v74_v1 = vld [vmem:[%s1129_s1 + $0x180] sm:$0xff]  ;;  %v121_v3 = vld [vmem:[%s1129_s1 + $0x2f8] sm:$0xff]  ;;  %v136_v4 = vld [vmem:[%s1129_s1 + $0x370] sm:$0xff] }
  0x18   :  { %184 = vmatpush.msra.mxu1 %v47_v42  ;;  %165 = vmatpush.msra.mxu0 %v30_v44  ;;  %v153_v5 = vld [vmem:[%s1129_s1 + $0x3f8] sm:$0xff]  ;;  %v103_v6 = vld [vmem:[%s1129_s1 + $0x268] sm:$0xff]  ;;  %v120_v7 = vld [vmem:[%s1129_s1 + $0x2f0] sm:$0xff] }
  0x19   :  { %224 = vmatpush.msra.mxu3 %v79_v43  ;;  %205 = vmatpush.msra.mxu2 %v62_v45  ;;  %v135_v8 = vld [vmem:[%s1129_s1 + $0x368] sm:$0xff]  ;;  %v152_v9 = vld [vmem:[%s1129_s1 + $0x3f0] sm:$0xff]  ;;  %v102_v10 = vld [vmem:[%s1129_s1 + $0x260] sm:$0xff] }
  0x1a   :  { %185 = vmatpush.msra.mxu1 %v46_v46  ;;  %166 = vmatpush.msra.mxu0 %v29_v48  ;;  %v119_v11 = vld [vmem:[%s1129_s1 + $0x2e8] sm:$0xff]  ;;  %v134_v12 = vld [vmem:[%s1129_s1 + $0x360] sm:$0xff]  ;;  %v101_v14 = vld [vmem:[%s1129_s1 + $0x258] sm:$0xff] }
  0x1b   :  { %225 = vmatpush.msra.mxu3 %v78_v47  ;;  %206 = vmatpush.msra.mxu2 %v61_v49  ;;  %v151_v13 = vld [vmem:[%s1129_s1 + $0x3e8] sm:$0xff]  ;;  %v118_v15 = vld [vmem:[%s1129_s1 + $0x2e0] sm:$0xff]  ;;  %v133_v16 = vld [vmem:[%s1129_s1 + $0x358] sm:$0xff] }
  0x1c   :  { %186 = vmatpush.msra.mxu1 %v45_v50  ;;  %167 = vmatpush.msra.mxu0 %v28_v52  ;;  %v150_v17 = vld [vmem:[%s1129_s1 + $0x3e0] sm:$0xff]  ;;  %v100_v18 = vld [vmem:[%s1129_s1 + $0x250] sm:$0xff]  ;;  %v117_v19 = vld [vmem:[%s1129_s1 + $0x2d8] sm:$0xff] }
  0x1d   :  { %226 = vmatpush.msra.mxu3 %v77_v51  ;;  %207 = vmatpush.msra.mxu2 %v60_v53  ;;  %v132_v20 = vld [vmem:[%s1129_s1 + $0x350] sm:$0xff]  ;;  %v149_v21 = vld [vmem:[%s1129_s1 + $0x3d8] sm:$0xff]  ;;  %v99_v22 = vld [vmem:[%s1129_s1 + $0x248] sm:$0xff] }
  0x1e   :  { %187 = vmatpush.msra.mxu1 %v44_v54  ;;  %168 = vmatpush.msra.mxu0 %v27_v56  ;;  %v116_v23 = vld [vmem:[%s1129_s1 + $0x2d0] sm:$0xff]  ;;  %v131_v24 = vld [vmem:[%s1129_s1 + $0x348] sm:$0xff]  ;;  %v98_v26 = vld [vmem:[%s1129_s1 + $0x240] sm:$0xff] }
  0x1f   :  { %227 = vmatpush.msra.mxu3 %v76_v55  ;;  %208 = vmatpush.msra.mxu2 %v59_v57  ;;  %v148_v25 = vld [vmem:[%s1129_s1 + $0x3d0] sm:$0xff]  ;;  %v115_v27 = vld [vmem:[%s1129_s1 + $0x2c8] sm:$0xff]  ;;  %v130_v28 = vld [vmem:[%s1129_s1 + $0x340] sm:$0xff] }
  0x20   :  { %188 = vmatpush.msra.mxu1 %v43_v58  ;;  %169 = vmatpush.msra.mxu0 %v26_v60  ;;  %v147_v29 = vld [vmem:[%s1129_s1 + $0x3c8] sm:$0xff]  ;;  %v97_v30 = vld [vmem:[%s1129_s1 + $0x238] sm:$0xff]  ;;  %v114_v31 = vld [vmem:[%s1129_s1 + $0x2c0] sm:$0xff] }
  0x21   :  { %228 = vmatpush.msra.mxu3 %v75_v59  ;;  %209 = vmatpush.msra.mxu2 %v58_v61  ;;  %v129_v32 = vld [vmem:[%s1129_s1 + $0x338] sm:$0xff]  ;;  %v146_v33 = vld [vmem:[%s1129_s1 + $0x3c0] sm:$0xff]  ;;  %v96_v34 = vld [vmem:[%s1129_s1 + $0x230] sm:$0xff] }
  0x22   :  { %234 = vmatpush.msrb.mxu0 %v105_v62  ;;  %189 = vmatpush.msra.mxu1 %v42_v0  ;;  %v113_v35 = vld [vmem:[%s1129_s1 + $0x2b8] sm:$0xff]  ;;  %v128_v36 = vld [vmem:[%s1129_s1 + $0x330] sm:$0xff]  ;;  %v95_v38 = vld [vmem:[%s1129_s1 + $0x228] sm:$0xff] }
  0x23   :  { %274 = vmatpush.msrb.mxu2 %v137_v63  ;;  %229 = vmatpush.msra.mxu3 %v74_v1  ;;  %v145_v37 = vld [vmem:[%s1129_s1 + $0x3b8] sm:$0xff]  ;;  %v112_v39 = vld [vmem:[%s1129_s1 + $0x2b0] sm:$0xff]  ;;  %v127_v40 = vld [vmem:[%s1129_s1 + $0x328] sm:$0xff] }
  0x24   :  { %235 = vmatpush.msrb.mxu0 %v104_v2  ;;  %254 = vmatpush.msrb.mxu1 %v121_v3  ;;  %v144_v41 = vld [vmem:[%s1129_s1 + $0x3b0] sm:$0xff]  ;;  %v94_v43 = vld [vmem:[%s1129_s1 + $0x220] sm:$0xff]  ;;  %v111_v44 = vld [vmem:[%s1129_s1 + $0x2a8] sm:$0xff] }
  0x25   :  { %275 = vmatpush.msrb.mxu2 %v136_v4  ;;  %294 = vmatpush.msrb.mxu3 %v153_v5  ;;  %v20_v42 = vld [vmem:[%s1130_s0 + $0x10] sm:$0xff]  ;;  %v126_v45 = vld [vmem:[%s1129_s1 + $0x320] sm:$0xff]  ;;  %v143_v46 = vld [vmem:[%s1129_s1 + $0x3a8] sm:$0xff] }
  0x26   :  { %236 = vmatpush.msrb.mxu0 %v103_v6  ;;  %255 = vmatpush.msrb.mxu1 %v120_v7  ;;  %v18_v47 = vld [vmem:[%s1130_s0] sm:$0xff]  ;;  %v21_v48 = vld [vmem:[%s1130_s0 + $0x18] sm:$0xff]  ;;  %v19_v53 = vld [vmem:[%s1130_s0 + $0x8] sm:$0xff] }
  0x27   :  { %276 = vmatpush.msrb.mxu2 %v135_v8  ;;  %295 = vmatpush.msrb.mxu3 %v152_v9  ;;  %v93_v49 = vld [vmem:[%s1129_s1 + $0x218] sm:$0xff]  ;;  %v110_v50 = vld [vmem:[%s1129_s1 + $0x2a0] sm:$0xff]  ;;  %v92_v54 = vld [vmem:[%s1129_s1 + $0x210] sm:$0xff] }
  0x28   :  { %237 = vmatpush.msrb.mxu0 %v102_v10  ;;  %256 = vmatpush.msrb.mxu1 %v119_v11  ;;  %v125_v51 = vld [vmem:[%s1129_s1 + $0x318] sm:$0xff]  ;;  %v142_v52 = vld [vmem:[%s1129_s1 + $0x3a0] sm:$0xff]  ;;  %v124_v56 = vld [vmem:[%s1129_s1 + $0x310] sm:$0xff] }
  0x29   :  { %277 = vmatpush.msrb.mxu2 %v134_v12  ;;  %296 = vmatpush.msrb.mxu3 %v151_v13  ;;  %v109_v55 = vld [vmem:[%s1129_s1 + $0x298] sm:$0xff]  ;;  %v91_v58 = vld [vmem:[%s1129_s1 + $0x208] sm:$0xff]  ;;  %v108_v59 = vld [vmem:[%s1129_s1 + $0x290] sm:$0xff] }
  0x2a   :  { %238 = vmatpush.msrb.mxu0 %v101_v14  ;;  %257 = vmatpush.msrb.mxu1 %v118_v15  ;;  %v141_v57 = vld [vmem:[%s1129_s1 + $0x398] sm:$0xff]  ;;  %v123_v60 = vld [vmem:[%s1129_s1 + $0x308] sm:$0xff]  ;;  %v140_v61 = vld [vmem:[%s1129_s1 + $0x390] sm:$0xff] }
  0x2b   :  { %278 = vmatpush.msrb.mxu2 %v133_v16  ;;  %297 = vmatpush.msrb.mxu3 %v150_v17  ;;  %v90_v62 = vld [vmem:[%s1129_s1 + $0x200] sm:$0xff]  ;;  %v107_v63 = vld [vmem:[%s1129_s1 + $0x288] sm:$0xff]  ;;  %v24_v3 = vld [vmem:[%s1130_s0 + $0x30] sm:$0xff] }
  0x2c   :  { %239 = vmatpush.msrb.mxu0 %v100_v18  ;;  %258 = vmatpush.msrb.mxu1 %v117_v19  ;;  %v122_v0 = vld [vmem:[%s1129_s1 + $0x300] sm:$0xff]  ;;  %v139_v1 = vld [vmem:[%s1129_s1 + $0x388] sm:$0xff]  ;;  %v25_v7 = vld [vmem:[%s1130_s0 + $0x38] sm:$0xff] }
  0x2d   :  { %279 = vmatpush.msrb.mxu2 %v132_v20  ;;  %298 = vmatpush.msrb.mxu3 %v149_v21  ;;  %v22_v2 = vld [vmem:[%s1130_s0 + $0x20] sm:$0xff]  ;;  %v23_v6 = vld [vmem:[%s1130_s0 + $0x28] sm:$0xff]  ;;  %v343_v8 = vld [vmem:[%s1131_s2 + $0xd0] sm:$0xff] }
  0x2e   :  { %240 = vmatpush.msrb.mxu0 %v99_v22  ;;  %259 = vmatpush.msrb.mxu1 %v116_v23  ;;  %v106_v4 = vld [vmem:[%s1129_s1 + $0x280] sm:$0xff]  ;;  %v344_v9 = vld [vmem:[%s1131_s2 + $0xd8] sm:$0xff]  ;;  %v342_v11 = vld [vmem:[%s1131_s2 + $0xc8] sm:$0xff] }
  0x2f   :  { %280 = vmatpush.msrb.mxu2 %v131_v24  ;;  %299 = vmatpush.msrb.mxu3 %v148_v25  ;;  %v138_v5 = vld [vmem:[%s1129_s1 + $0x380] sm:$0xff]  ;;  %v335_v12 = vld [vmem:[%s1131_s2 + $0x90] sm:$0xff]  ;;  %v336_v13 = vld [vmem:[%s1131_s2 + $0x98] sm:$0xff] }
  0x30   :  { %241 = vmatpush.msrb.mxu0 %v98_v26  ;;  %260 = vmatpush.msrb.mxu1 %v115_v27  ;;  %v341_v10 = vld [vmem:[%s1131_s2 + $0xc0] sm:$0xff]  ;;  %v334_v15 = vld [vmem:[%s1131_s2 + $0x88] sm:$0xff]  ;;  %v327_v16 = vld [vmem:[%s1131_s2 + $0x50] sm:$0xff] }
  0x31   :  { %281 = vmatpush.msrb.mxu2 %v130_v28  ;;  %300 = vmatpush.msrb.mxu3 %v147_v29  ;;  %v333_v14 = vld [vmem:[%s1131_s2 + $0x80] sm:$0xff]  ;;  %v328_v17 = vld [vmem:[%s1131_s2 + $0x58] sm:$0xff]  ;;  %v326_v19 = vld [vmem:[%s1131_s2 + $0x48] sm:$0xff] }
  0x32   :  { %242 = vmatpush.msrb.mxu0 %v97_v30  ;;  %261 = vmatpush.msrb.mxu1 %v114_v31  ;;  %v325_v18 = vld [vmem:[%s1131_s2 + $0x40] sm:$0xff]  ;;  %v319_v20 = vld [vmem:[%s1131_s2 + $0x10] sm:$0xff]  ;;  %v320_v21 = vld [vmem:[%s1131_s2 + $0x18] sm:$0xff] }
  0x33   :  { %282 = vmatpush.msrb.mxu2 %v129_v32  ;;  %301 = vmatpush.msrb.mxu3 %v146_v33  ;;  %v317_v22 = vld [vmem:[%s1131_s2] sm:$0xff]  ;;  %v318_v23 = vld [vmem:[%s1131_s2 + $0x8] sm:$0xff]  ;;  %v347_v24 = vld [vmem:[%s1131_s2 + $0xf0] sm:$0xff] }
  0x34   :  { %243 = vmatpush.msrb.mxu0 %v96_v34  ;;  %262 = vmatpush.msrb.mxu1 %v113_v35  ;;  %v348_v25 = vld [vmem:[%s1131_s2 + $0xf8] sm:$0xff]  ;;  %v345_v26 = vld [vmem:[%s1131_s2 + $0xe0] sm:$0xff]  ;;  %v346_v27 = vld [vmem:[%s1131_s2 + $0xe8] sm:$0xff] }
  0x35   :  { %283 = vmatpush.msrb.mxu2 %v128_v36  ;;  %302 = vmatpush.msrb.mxu3 %v145_v37  ;;  %v339_v28 = vld [vmem:[%s1131_s2 + $0xb0] sm:$0xff]  ;;  %v340_v29 = vld [vmem:[%s1131_s2 + $0xb8] sm:$0xff]  ;;  %v337_v31 = vld [vmem:[%s1131_s2 + $0xa0] sm:$0xff] }
  0x36   :  { %244 = vmatpush.msrb.mxu0 %v95_v38  ;;  %263 = vmatpush.msrb.mxu1 %v112_v39  ;;  %v338_v32 = vld [vmem:[%s1131_s2 + $0xa8] sm:$0xff]  ;;  %v331_v33 = vld [vmem:[%s1131_s2 + $0x70] sm:$0xff]  ;;  %v332_v34 = vld [vmem:[%s1131_s2 + $0x78] sm:$0xff] }
  0x37   :  { %284 = vmatpush.msrb.mxu2 %v127_v40  ;;  %303 = vmatpush.msrb.mxu3 %v144_v41  ;;  %v329_v35 = vld [vmem:[%s1131_s2 + $0x60] sm:$0xff]  ;;  %v330_v36 = vld [vmem:[%s1131_s2 + $0x68] sm:$0xff]  ;;  %v323_v37 = vld [vmem:[%s1131_s2 + $0x30] sm:$0xff] }
  0x38   :  { %210 = vmatmul.f32.vlgmr.msra.gmra.mxu2 %v20_v42  ;;  %245 = vmatpush.msrb.mxu0 %v94_v43  ;;  %v324_v38 = vld [vmem:[%s1131_s2 + $0x38] sm:$0xff]  ;;  %v321_v40 = vld [vmem:[%s1131_s2 + $0x20] sm:$0xff]  ;;  %v322_v41 = vld [vmem:[%s1131_s2 + $0x28] sm:$0xff] }
  0x39   :  { %264 = vmatpush.msrb.mxu1 %v111_v44  ;;  %285 = vmatpush.msrb.mxu2 %v126_v45 }
  0x3a   :  { %304 = vmatpush.msrb.mxu3 %v143_v46  ;;  %170 = vmatmul.f32.vlgmr.msra.gmra.mxu0 %v18_v47 }
  0x3b   :  { %230 = vmatmul.f32.vlgmr.msra.gmra.mxu3 %v21_v48  ;;  %246 = vmatpush.msrb.mxu0 %v93_v49 }
  0x3c   :  { %265 = vmatpush.msrb.mxu1 %v110_v50  ;;  %286 = vmatpush.msrb.mxu2 %v125_v51 }
  0x3d   :  { %305 = vmatpush.msrb.mxu3 %v142_v52  ;;  %190 = vmatmul.f32.vlgmr.msra.gmra.mxu1 %v19_v53 }
  0x3e   :  { %247 = vmatpush.msrb.mxu0 %v92_v54  ;;  %266 = vmatpush.msrb.mxu1 %v109_v55 }
  0x3f   :  { %287 = vmatpush.msrb.mxu2 %v124_v56  ;;  %306 = vmatpush.msrb.mxu3 %v141_v57 }
  0x40   :  { %248 = vmatpush.msrb.mxu0 %v91_v58  ;;  %267 = vmatpush.msrb.mxu1 %v108_v59 }
  0x41   :  { %288 = vmatpush.msrb.mxu2 %v123_v60  ;;  %307 = vmatpush.msrb.mxu3 %v140_v61 }
  0x42   :  { %249 = vmatpush.msrb.mxu0 %v90_v62  ;;  %268 = vmatpush.msrb.mxu1 %v107_v63 }
  0x43   :  { %289 = vmatpush.msrb.mxu2 %v122_v0  ;;  %308 = vmatpush.msrb.mxu3 %v139_v1 }
  0x44   :  { %250 = vmatmul.f32.vlgmr.msrb.gmra.mxu0 %v22_v2  ;;  %290 = vmatmul.f32.vlgmr.msrb.gmra.mxu2 %v24_v3 }
  0x45   :  { %269 = vmatpush.msrb.mxu1 %v106_v4  ;;  %309 = vmatpush.msrb.mxu3 %v138_v5 }
  0x46   :  { %270 = vmatmul.f32.vlgmr.msrb.gmra.mxu1 %v23_v6  ;;  %310 = vmatmul.f32.vlgmr.msrb.gmra.mxu3 %v25_v7 }
  0x47   :  { %405 = vmatpush.msra.mxu2 %v343_v8  ;;  %425 = vmatpush.msra.mxu3 %v344_v9 }
  0x48   :  { %365 = vmatpush.msra.mxu0 %v341_v10  ;;  %385 = vmatpush.msra.mxu1 %v342_v11 }
  0x49   :  { %406 = vmatpush.msra.mxu2 %v335_v12  ;;  %426 = vmatpush.msra.mxu3 %v336_v13 }
  0x4a   :  { %366 = vmatpush.msra.mxu0 %v333_v14  ;;  %386 = vmatpush.msra.mxu1 %v334_v15 }
  0x4b   :  { %407 = vmatpush.msra.mxu2 %v327_v16  ;;  %427 = vmatpush.msra.mxu3 %v328_v17 }
  0x4c   :  { %367 = vmatpush.msra.mxu0 %v325_v18  ;;  %387 = vmatpush.msra.mxu1 %v326_v19 }
  0x4d   :  { %408 = vmatpush.msra.mxu2 %v319_v20  ;;  %428 = vmatpush.msra.mxu3 %v320_v21 }
  0x4e   :  { %368 = vmatpush.msra.mxu0 %v317_v22  ;;  %388 = vmatpush.msra.mxu1 %v318_v23 }
  0x4f   :  { %485 = vmatpush.msrb.mxu2 %v347_v24  ;;  %505 = vmatpush.msrb.mxu3 %v348_v25 }
  0x50   :  { %445 = vmatpush.msrb.mxu0 %v345_v26  ;;  %465 = vmatpush.msrb.mxu1 %v346_v27 }
  0x51   :  { %486 = vmatpush.msrb.mxu2 %v339_v28  ;;  %506 = vmatpush.msrb.mxu3 %v340_v29 }
  0x52   :  { %446 = vmatpush.msrb.mxu0 %v337_v31  ;;  %466 = vmatpush.msrb.mxu1 %v338_v32 }
  0x53   :  { %487 = vmatpush.msrb.mxu2 %v331_v33  ;;  %507 = vmatpush.msrb.mxu3 %v332_v34 }
  0x54   :  { %447 = vmatpush.msrb.mxu0 %v329_v35  ;;  %467 = vmatpush.msrb.mxu1 %v330_v36 }
  0x55   :  { %488 = vmatpush.msrb.mxu2 %v323_v37  ;;  %508 = vmatpush.msrb.mxu3 %v324_v38 }
  0x56   :  { %448 = vmatpush.msrb.mxu0 %v321_v40  ;;  %468 = vmatpush.msrb.mxu1 %v322_v41 }
  0xb7   :  { %v171_v30 = vpop.f32.mrf.mxu0 }
  0xba   :  { %v191_v39 = vpop.f32.mrf.mxu1 }
  0xbb   :  { %v192_v42 = vadd.f32 %v191_v39, %v171_v30  ;;  %v211_v43 = vpop.f32.mrf.mxu2 }
  0xbd   :  { %v212_v44 = vadd.f32 %v211_v43, %v192_v42 }
  0xbe   :  { %v231_v45 = vpop.f32.mrf.mxu3 }
  0xbf   :  { %v232_v46 = vadd.f32 %v231_v45, %v212_v44 }
  0xc1   :  { %v251_v47 = vpop.f32.mrf.mxu0 }
  0xc2   :  { %v252_v48 = vadd.f32 %v251_v47, %v232_v46 }
  0xc3   :  { %v271_v49 = vpop.f32.mrf.mxu1 }
  0xc4   :  { %v272_v50 = vadd.f32 %v271_v49, %v252_v48 }
  0xc7   :  { %v291_v51 = vpop.f32.mrf.mxu2 }
  0xc8   :  { %v292_v52 = vadd.f32 %v291_v51, %v272_v50 }
  0xc9   :  { %v311_v53 = vpop.f32.mrf.mxu3 }
  0xca   :  { %v312_v54 = vadd.f32 %v311_v53, %v292_v52 }
  0xcc   :  { %315 = vst.msk [vmem:[#allocation2] sm:$0xff] %vm314_vm0, %v312_v54 }
  0xd3   :  { %v316_v55 = vld [vmem:[#allocation2] sm:$0xff] }
  0xd4   :  { %557 = vmatmul.msk.f32.vlgmr.msra.gmra.mxu0 %vm314_vm0, %v316_v55  ;;  %558 = vmatmul.msk.f32.vlgmr.msra.gmra.mxu1 %vm314_vm0, %v316_v55 }
  0xd5   :  { %559 = vmatmul.msk.f32.vlgmr.msra.gmra.mxu2 %vm314_vm0, %v316_v55  ;;  %560 = vmatmul.msk.f32.vlgmr.msra.gmra.mxu3 %vm314_vm0, %v316_v55 }
  0xdc   :  { %561 = vmatmul.msk.f32.vlgmr.msrb.gmra.mxu0 %vm314_vm0, %v316_v55  ;;  %562 = vmatmul.msk.f32.vlgmr.msrb.gmra.mxu1 %vm314_vm0, %v316_v55 }
  0xdd   :  { %563 = vmatmul.msk.f32.vlgmr.msrb.gmra.mxu2 %vm314_vm0, %v316_v55  ;;  %564 = vmatmul.msk.f32.vlgmr.msrb.gmra.mxu3 %vm314_vm0, %v316_v55 }
 0x151   :  { %v370_v56 = vpop.f32.mrf.mxu0  ;;  %v390_v57 = vpop.f32.mrf.mxu1 }
 0x152   :  { %v513_v58 = vmul.f32 0.5, %v370_v56  ;;  %v514_v59 = vmul.f32 0.5, %v390_v57 }
 0x154   :  { %565 = vtanh.f32 %v513_v58 }
 0x155   :  { %567 = vtanh.f32 %v514_v59 }
 0x158   :  { %v410_v60 = vpop.f32.mrf.mxu2  ;;  %v430_v61 = vpop.f32.mrf.mxu3 }
 0x159   :  { %v515_v62 = vmul.f32 0.5, %v410_v60  ;;  %v516_v63 = vmul.f32 0.5, %v430_v61  ;;  %v450_v0 = vpop.f32.mrf.mxu0  ;;  %v470_v1 = vpop.f32.mrf.mxu1 }
 0x15a   :  { %v566_v2 = vpop.eup %565  ;;  %v517_v3 = vmul.f32 0.5, %v450_v0  ;;  %v518_v4 = vmul.f32 0.5, %v470_v1 }
 0x15b   :  { %v568_v5 = vpop.eup %567  ;;  %v529_v6 = vadd.f32 1.0, %v566_v2  ;;  %569 = vtanh.f32 %v515_v62 }
 0x15c   :  { %v530_v7 = vadd.f32 1.0, %v568_v5  ;;  %571 = vtanh.f32 %v516_v63 }
 0x15d   :  { %v537_v8 = vmul.f32 0.5, %v529_v6  ;;  %573 = vtanh.f32 %v517_v3 }
 0x15e   :  { %v538_v9 = vmul.f32 0.5, %v530_v7  ;;  %575 = vtanh.f32 %v518_v4 }
 0x15f   :  { %545 = vst [vmem:[%s1132_s3] sm:$0xff] %v537_v8 }
 0x160   :  { %546 = vst [vmem:[%s1132_s3 + $0x8] sm:$0xff] %v538_v9  ;;  %v490_v10 = vpop.f32.mrf.mxu2  ;;  %v510_v11 = vpop.f32.mrf.mxu3 }
 0x161   :  { %v570_v12 = vpop.eup %569  ;;  %v519_v13 = vmul.f32 0.5, %v490_v10  ;;  %v520_v14 = vmul.f32 0.5, %v510_v11 }
 0x162   :  { %v572_v15 = vpop.eup %571  ;;  %v531_v16 = vadd.f32 1.0, %v570_v12 }
 0x163   :  { %v574_v17 = vpop.eup %573  ;;  %v532_v18 = vadd.f32 1.0, %v572_v15  ;;  %577 = vtanh.f32 %v519_v13 }
 0x164   :  { %v576_v19 = vpop.eup %575  ;;  %v539_v20 = vmul.f32 0.5, %v531_v16  ;;  %v533_v21 = vadd.f32 1.0, %v574_v17  ;;  %579 = vtanh.f32 %v520_v14 }
 0x165   :  { %v540_v22 = vmul.f32 0.5, %v532_v18  ;;  %v534_v23 = vadd.f32 1.0, %v576_v19 }
 0x166   :  { %547 = vst [vmem:[%s1132_s3 + $0x10] sm:$0xff] %v539_v20  ;;  %v541_v24 = vmul.f32 0.5, %v533_v21 }
 0x167   :  { %548 = vst [vmem:[%s1132_s3 + $0x18] sm:$0xff] %v540_v22  ;;  %v542_v25 = vmul.f32 0.5, %v534_v23 }
 0x168   :  { %549 = vst [vmem:[%s1132_s3 + $0x20] sm:$0xff] %v541_v24 }
 0x169   :  { %v578_v26 = vpop.eup %577  ;;  %550 = vst [vmem:[%s1132_s3 + $0x28] sm:$0xff] %v542_v25 }
 0x16a   :  { %v580_v27 = vpop.eup %579  ;;  %v535_v28 = vadd.f32 1.0, %v578_v26 }
 0x16b   :  { %v536_v29 = vadd.f32 1.0, %v580_v27 }
 0x16c   :  { %v543_v30 = vmul.f32 0.5, %v535_v28 }
 0x16d   :  { %v544_v31 = vmul.f32 0.5, %v536_v29 }
 0x16e   :  { %551 = vst [vmem:[%s1132_s3 + $0x30] sm:$0xff] %v543_v30 }
 0x16f   :  { %552 = vst [vmem:[%s1132_s3 + $0x38] sm:$0xff] %v544_v31 }

</bundles_post_ra>
